<compile_context>
chip_gen: v7x
topology: tpu7x:2x2x1
jax: 0.10.0
libtpu: 0.0.40
codegen_flags: <defaults>
</compile_context>

<pallas_src>
import jax
import jax.numpy as jnp
from jax.experimental import pallas as pl
from jax.experimental.pallas import tpu as pltpu

LANE = 128            # samples per lane-row
MAX_TILE_ROWS = 512   # sublane rows (of 128 samples each) per grid step


def _mlp_kernel(x_ref, w1_ref, b1_ref, w2_ref, b2_ref, w3_ref, b3_ref, o_ref):
    """Batch-on-lanes 3-layer MLP.

    x_ref : (2, TR, 128) f32 VMEM  -- feature-major, batch on (sublane, lane)
    w*_ref: flat f32 SMEM, row-major (in, out); b*_ref: flat f32 SMEM
    o_ref : (TR, 128) f32 VMEM     -- lane-dense sigmoid output
    """
    x0 = x_ref[0]          # (TR, 128)
    x1 = x_ref[1]

    # hidden1: 2 -> 4, ReLU   (scalar-broadcast FMAs on the VPU)
    h1 = []
    for j in range(4):
        a = x0 * w1_ref[j] + x1 * w1_ref[4 + j] + b1_ref[j]
        h1.append(jnp.maximum(a, 0.0))

    # hidden2: 4 -> 8, ReLU
    h2 = []
    for k in range(8):
        acc = h1[0] * w2_ref[k]
        for j in range(1, 4):
            acc = acc + h1[j] * w2_ref[j * 8 + k]
        h2.append(jnp.maximum(acc + b2_ref[k], 0.0))

    # output: 8 -> 1, sigmoid  (exp lands on the EUP slot)
    acc = h2[0] * w3_ref[0]
    for k in range(1, 8):
        acc = acc + h2[k] * w3_ref[k]
    o_ref[...] = jax.nn.sigmoid(acc + b3_ref[0])


def _round_up(n, m):
    return -(-n // m) * m


@jax.jit
def xormodel_forward(x, params):
    """x: (B, 2) float32 -> (B, 1) float32 (matches Xormodel.forward)."""
    w1, b1, w2, b2, w3, b3 = params
    B = x.shape[0]

    # Batch tiling: rows of 128 samples; tile up to MAX_TILE_ROWS rows/step.
    rows = _round_up(max(B, 1), LANE) // LANE
    tile_rows = min(MAX_TILE_ROWS, _round_up(rows, 8))
    rows_p = _round_up(rows, tile_rows)
    n_pad = rows_p * LANE

    # (B, 2) -> (2, rows_p, 128); zero padding for the tail samples.
    xp = jnp.pad(x.T.astype(jnp.float32),
                 ((0, 0), (0, n_pad - B))).reshape(2, rows_p, LANE)

    smem = pl.BlockSpec(memory_space=pltpu.MemorySpace.SMEM)
    out = pl.pallas_call(
        _mlp_kernel,
        out_shape=jax.ShapeDtypeStruct((rows_p, LANE), jnp.float32),
        grid=(rows_p // tile_rows,),
        in_specs=[
            pl.BlockSpec((2, tile_rows, LANE), lambda i: (0, i, 0)),  # x tiles
            smem, smem, smem, smem, smem, smem,                       # params
        ],
        out_specs=pl.BlockSpec((tile_rows, LANE), lambda i: (i, 0)),
        compiler_params=pltpu.CompilerParams(
            dimension_semantics=("parallel",)),
    )(xp,
      w1.reshape(-1).astype(jnp.float32), b1.astype(jnp.float32),
      w2.reshape(-1).astype(jnp.float32), b2.astype(jnp.float32),
      w3.reshape(-1).astype(jnp.float32), b3.astype(jnp.float32))

    return out.reshape(-1)[:B].reshape(B, 1)


def init_params(key):
    """Deterministic init matching nn.Linear shapes (stored as [in, out]).

    Note: PyTorch nn.Linear stores weight as (out, in); these are (in, out)
    for `x @ W`.  Transpose when loading real PyTorch weights.
    """
    k1, k2, k3, k4, k5, k6 = jax.random.split(key, 6)

    def unif(k, shape, fan_in):
        bound = 1.0 / jnp.sqrt(fan_in)
        return jax.random.uniform(k, shape, jnp.float32, -bound, bound)

    w1 = unif(k1, (2, 4), 2.0)
    b1 = unif(k2, (4,), 2.0)
    w2 = unif(k3, (4, 8), 4.0)
    b2 = unif(k4, (8,), 4.0)
    w3 = unif(k5, (8, 1), 8.0)
    b3 = unif(k6, (1,), 8.0)
    return (w1, b1, w2, b2, w3, b3)


def reference_forward(x, params):
    w1, b1, w2, b2, w3, b3 = params
    h1 = jnp.maximum(x @ w1 + b1, 0.0)
    h2 = jnp.maximum(h1 @ w2 + b2, 0.0)
    return jax.nn.sigmoid(h2 @ w3 + b3)


if __name__ == "__main__":
    key = jax.random.PRNGKey(0)
    params = init_params(key)

    # Classic XOR inputs plus a few random rows (batch=8, features=2).
    xor = jnp.array([[0, 0], [0, 1], [1, 0], [1, 1]], dtype=jnp.float32)
    extra = jax.random.uniform(jax.random.PRNGKey(1), (4, 2), jnp.float32)
    x = jnp.concatenate([xor, extra], axis=0)          # (8, 2)

    y = xormodel_forward(x, params)
    y = jax.block_until_ready(y)

    y_ref = reference_forward(x, params)
    assert y.shape == (8, 1), y.shape
    assert jnp.allclose(y, y_ref, atol=1e-5, rtol=1e-5), (y, y_ref)
    print("KERNEL_OK")
</pallas_src>

<mosaic_0001>
module attributes {stable_mosaic.version = 11 : i64} {
  func.func @_mlp_kernel(%arg0: i32, %arg1: memref<2x8x128xf32, #tpu.memory_space<vmem>>, %arg2: memref<8xf32, #tpu.memory_space<smem>>, %arg3: memref<4xf32, #tpu.memory_space<smem>>, %arg4: memref<32xf32, #tpu.memory_space<smem>>, %arg5: memref<8xf32, #tpu.memory_space<smem>>, %arg6: memref<8xf32, #tpu.memory_space<smem>>, %arg7: memref<1xf32, #tpu.memory_space<smem>>, %arg8: memref<8x128xf32, #tpu.memory_space<vmem>>) attributes {dimension_semantics = [#tpu.dimension_semantics<parallel>], iteration_bounds = array<i64: 1>, scalar_prefetch = 0 : i64, scratch_operands = 0 : i64, tpu.core_type = #tpu.core_type<tc>, window_params = [{transform_indices = @transform_0, window_bounds = array<i64: 2, 8, 128>}, {transform_indices = @transform_1, window_bounds = array<i64: 8>}, {transform_indices = @transform_2, window_bounds = array<i64: 4>}, {transform_indices = @transform_3, window_bounds = array<i64: 32>}, {transform_indices = @transform_4, window_bounds = array<i64: 8>}, {transform_indices = @transform_5, window_bounds = array<i64: 8>}, {transform_indices = @transform_6, window_bounds = array<i64: 1>}, {transform_indices = @transform_7, window_bounds = array<i64: 8, 128>}]} {
    %c0 = arith.constant 0 : index
    %c0_0 = arith.constant 0 : index
    %c0_1 = arith.constant 0 : index
    %0 = vector.load %arg1[%c0, %c0_0, %c0_1] : memref<2x8x128xf32, #tpu.memory_space<vmem>>, vector<1x8x128xf32>
    %1 = vector.shape_cast %0 : vector<1x8x128xf32> to vector<8x128xf32>
    %c1 = arith.constant 1 : index
    %c0_2 = arith.constant 0 : index
    %c0_3 = arith.constant 0 : index
    %2 = vector.load %arg1[%c1, %c0_2, %c0_3] : memref<2x8x128xf32, #tpu.memory_space<vmem>>, vector<1x8x128xf32>
    %3 = vector.shape_cast %2 : vector<1x8x128xf32> to vector<8x128xf32>
    %c0_4 = arith.constant 0 : index
    %4 = memref.load %arg2[%c0_4] : memref<8xf32, #tpu.memory_space<smem>>
    %5 = vector.broadcast %4 : f32 to vector<8x128xf32>
    %6 = arith.mulf %1, %5 : vector<8x128xf32>
    %c4 = arith.constant 4 : index
    %7 = memref.load %arg2[%c4] : memref<8xf32, #tpu.memory_space<smem>>
    %8 = vector.broadcast %7 : f32 to vector<8x128xf32>
    %9 = arith.mulf %3, %8 : vector<8x128xf32>
    %10 = arith.addf %6, %9 : vector<8x128xf32>
    %c0_5 = arith.constant 0 : index
    %11 = memref.load %arg3[%c0_5] : memref<4xf32, #tpu.memory_space<smem>>
    %12 = vector.broadcast %11 : f32 to vector<8x128xf32>
    %13 = arith.addf %10, %12 : vector<8x128xf32>
    %cst = arith.constant 0.000000e+00 : f32
    %14 = vector.broadcast %cst : f32 to vector<8x128xf32>
    %15 = arith.maximumf %13, %14 : vector<8x128xf32>
    %c1_6 = arith.constant 1 : index
    %16 = memref.load %arg2[%c1_6] : memref<8xf32, #tpu.memory_space<smem>>
    %17 = vector.broadcast %16 : f32 to vector<8x128xf32>
    %18 = arith.mulf %1, %17 : vector<8x128xf32>
    %c5 = arith.constant 5 : index
    %19 = memref.load %arg2[%c5] : memref<8xf32, #tpu.memory_space<smem>>
    %20 = vector.broadcast %19 : f32 to vector<8x128xf32>
    %21 = arith.mulf %3, %20 : vector<8x128xf32>
    %22 = arith.addf %18, %21 : vector<8x128xf32>
    %c1_7 = arith.constant 1 : index
    %23 = memref.load %arg3[%c1_7] : memref<4xf32, #tpu.memory_space<smem>>
    %24 = vector.broadcast %23 : f32 to vector<8x128xf32>
    %25 = arith.addf %22, %24 : vector<8x128xf32>
    %cst_8 = arith.constant 0.000000e+00 : f32
    %26 = vector.broadcast %cst_8 : f32 to vector<8x128xf32>
    %27 = arith.maximumf %25, %26 : vector<8x128xf32>
    %c2 = arith.constant 2 : index
    %28 = memref.load %arg2[%c2] : memref<8xf32, #tpu.memory_space<smem>>
    %29 = vector.broadcast %28 : f32 to vector<8x128xf32>
    %30 = arith.mulf %1, %29 : vector<8x128xf32>
    %c6 = arith.constant 6 : index
    %31 = memref.load %arg2[%c6] : memref<8xf32, #tpu.memory_space<smem>>
    %32 = vector.broadcast %31 : f32 to vector<8x128xf32>
    %33 = arith.mulf %3, %32 : vector<8x128xf32>
    %34 = arith.addf %30, %33 : vector<8x128xf32>
    %c2_9 = arith.constant 2 : index
    %35 = memref.load %arg3[%c2_9] : memref<4xf32, #tpu.memory_space<smem>>
    %36 = vector.broadcast %35 : f32 to vector<8x128xf32>
    %37 = arith.addf %34, %36 : vector<8x128xf32>
    %cst_10 = arith.constant 0.000000e+00 : f32
    %38 = vector.broadcast %cst_10 : f32 to vector<8x128xf32>
    %39 = arith.maximumf %37, %38 : vector<8x128xf32>
    %c3 = arith.constant 3 : index
    %40 = memref.load %arg2[%c3] : memref<8xf32, #tpu.memory_space<smem>>
    %41 = vector.broadcast %40 : f32 to vector<8x128xf32>
    %42 = arith.mulf %1, %41 : vector<8x128xf32>
    %c7 = arith.constant 7 : index
    %43 = memref.load %arg2[%c7] : memref<8xf32, #tpu.memory_space<smem>>
    %44 = vector.broadcast %43 : f32 to vector<8x128xf32>
    %45 = arith.mulf %3, %44 : vector<8x128xf32>
    %46 = arith.addf %42, %45 : vector<8x128xf32>
    %c3_11 = arith.constant 3 : index
    %47 = memref.load %arg3[%c3_11] : memref<4xf32, #tpu.memory_space<smem>>
    %48 = vector.broadcast %47 : f32 to vector<8x128xf32>
    %49 = arith.addf %46, %48 : vector<8x128xf32>
    %cst_12 = arith.constant 0.000000e+00 : f32
    %50 = vector.broadcast %cst_12 : f32 to vector<8x128xf32>
    %51 = arith.maximumf %49, %50 : vector<8x128xf32>
    %c0_13 = arith.constant 0 : index
    %52 = memref.load %arg4[%c0_13] : memref<32xf32, #tpu.memory_space<smem>>
    %53 = vector.broadcast %52 : f32 to vector<8x128xf32>
    %54 = arith.mulf %15, %53 : vector<8x128xf32>
    %c8 = arith.constant 8 : index
    %55 = memref.load %arg4[%c8] : memref<32xf32, #tpu.memory_space<smem>>
    %56 = vector.broadcast %55 : f32 to vector<8x128xf32>
    %57 = arith.mulf %27, %56 : vector<8x128xf32>
    %58 = arith.addf %54, %57 : vector<8x128xf32>
    %c16 = arith.constant 16 : index
    %59 = memref.load %arg4[%c16] : memref<32xf32, #tpu.memory_space<smem>>
    %60 = vector.broadcast %59 : f32 to vector<8x128xf32>
    %61 = arith.mulf %39, %60 : vector<8x128xf32>
    %62 = arith.addf %58, %61 : vector<8x128xf32>
    %c24 = arith.constant 24 : index
    %63 = memref.load %arg4[%c24] : memref<32xf32, #tpu.memory_space<smem>>
    %64 = vector.broadcast %63 : f32 to vector<8x128xf32>
    %65 = arith.mulf %51, %64 : vector<8x128xf32>
    %66 = arith.addf %62, %65 : vector<8x128xf32>
    %c0_14 = arith.constant 0 : index
    %67 = memref.load %arg5[%c0_14] : memref<8xf32, #tpu.memory_space<smem>>
    %68 = vector.broadcast %67 : f32 to vector<8x128xf32>
    %69 = arith.addf %66, %68 : vector<8x128xf32>
    %cst_15 = arith.constant 0.000000e+00 : f32
    %70 = vector.broadcast %cst_15 : f32 to vector<8x128xf32>
    %71 = arith.maximumf %69, %70 : vector<8x128xf32>
    %c1_16 = arith.constant 1 : index
    %72 = memref.load %arg4[%c1_16] : memref<32xf32, #tpu.memory_space<smem>>
    %73 = vector.broadcast %72 : f32 to vector<8x128xf32>
    %74 = arith.mulf %15, %73 : vector<8x128xf32>
    %c9 = arith.constant 9 : index
    %75 = memref.load %arg4[%c9] : memref<32xf32, #tpu.memory_space<smem>>
    %76 = vector.broadcast %75 : f32 to vector<8x128xf32>
    %77 = arith.mulf %27, %76 : vector<8x128xf32>
    %78 = arith.addf %74, %77 : vector<8x128xf32>
    %c17 = arith.constant 17 : index
    %79 = memref.load %arg4[%c17] : memref<32xf32, #tpu.memory_space<smem>>
    %80 = vector.broadcast %79 : f32 to vector<8x128xf32>
    %81 = arith.mulf %39, %80 : vector<8x128xf32>
    %82 = arith.addf %78, %81 : vector<8x128xf32>
    %c25 = arith.constant 25 : index
    %83 = memref.load %arg4[%c25] : memref<32xf32, #tpu.memory_space<smem>>
    %84 = vector.broadcast %83 : f32 to vector<8x128xf32>
    %85 = arith.mulf %51, %84 : vector<8x128xf32>
    %86 = arith.addf %82, %85 : vector<8x128xf32>
    %c1_17 = arith.constant 1 : index
    %87 = memref.load %arg5[%c1_17] : memref<8xf32, #tpu.memory_space<smem>>
    %88 = vector.broadcast %87 : f32 to vector<8x128xf32>
    %89 = arith.addf %86, %88 : vector<8x128xf32>
    %cst_18 = arith.constant 0.000000e+00 : f32
    %90 = vector.broadcast %cst_18 : f32 to vector<8x128xf32>
    %91 = arith.maximumf %89, %90 : vector<8x128xf32>
    %c2_19 = arith.constant 2 : index
    %92 = memref.load %arg4[%c2_19] : memref<32xf32, #tpu.memory_space<smem>>
    %93 = vector.broadcast %92 : f32 to vector<8x128xf32>
    %94 = arith.mulf %15, %93 : vector<8x128xf32>
    %c10 = arith.constant 10 : index
    %95 = memref.load %arg4[%c10] : memref<32xf32, #tpu.memory_space<smem>>
    %96 = vector.broadcast %95 : f32 to vector<8x128xf32>
    %97 = arith.mulf %27, %96 : vector<8x128xf32>
    %98 = arith.addf %94, %97 : vector<8x128xf32>
    %c18 = arith.constant 18 : index
    %99 = memref.load %arg4[%c18] : memref<32xf32, #tpu.memory_space<smem>>
    %100 = vector.broadcast %99 : f32 to vector<8x128xf32>
    %101 = arith.mulf %39, %100 : vector<8x128xf32>
    %102 = arith.addf %98, %101 : vector<8x128xf32>
    %c26 = arith.constant 26 : index
    %103 = memref.load %arg4[%c26] : memref<32xf32, #tpu.memory_space<smem>>
    %104 = vector.broadcast %103 : f32 to vector<8x128xf32>
    %105 = arith.mulf %51, %104 : vector<8x128xf32>
    %106 = arith.addf %102, %105 : vector<8x128xf32>
    %c2_20 = arith.constant 2 : index
    %107 = memref.load %arg5[%c2_20] : memref<8xf32, #tpu.memory_space<smem>>
    %108 = vector.broadcast %107 : f32 to vector<8x128xf32>
    %109 = arith.addf %106, %108 : vector<8x128xf32>
    %cst_21 = arith.constant 0.000000e+00 : f32
    %110 = vector.broadcast %cst_21 : f32 to vector<8x128xf32>
    %111 = arith.maximumf %109, %110 : vector<8x128xf32>
    %c3_22 = arith.constant 3 : index
    %112 = memref.load %arg4[%c3_22] : memref<32xf32, #tpu.memory_space<smem>>
    %113 = vector.broadcast %112 : f32 to vector<8x128xf32>
    %114 = arith.mulf %15, %113 : vector<8x128xf32>
    %c11 = arith.constant 11 : index
    %115 = memref.load %arg4[%c11] : memref<32xf32, #tpu.memory_space<smem>>
    %116 = vector.broadcast %115 : f32 to vector<8x128xf32>
    %117 = arith.mulf %27, %116 : vector<8x128xf32>
    %118 = arith.addf %114, %117 : vector<8x128xf32>
    %c19 = arith.constant 19 : index
    %119 = memref.load %arg4[%c19] : memref<32xf32, #tpu.memory_space<smem>>
    %120 = vector.broadcast %119 : f32 to vector<8x128xf32>
    %121 = arith.mulf %39, %120 : vector<8x128xf32>
    %122 = arith.addf %118, %121 : vector<8x128xf32>
    %c27 = arith.constant 27 : index
    %123 = memref.load %arg4[%c27] : memref<32xf32, #tpu.memory_space<smem>>
    %124 = vector.broadcast %123 : f32 to vector<8x128xf32>
    %125 = arith.mulf %51, %124 : vector<8x128xf32>
    %126 = arith.addf %122, %125 : vector<8x128xf32>
    %c3_23 = arith.constant 3 : index
    %127 = memref.load %arg5[%c3_23] : memref<8xf32, #tpu.memory_space<smem>>
    %128 = vector.broadcast %127 : f32 to vector<8x128xf32>
    %129 = arith.addf %126, %128 : vector<8x128xf32>
    %cst_24 = arith.constant 0.000000e+00 : f32
    %130 = vector.broadcast %cst_24 : f32 to vector<8x128xf32>
    %131 = arith.maximumf %129, %130 : vector<8x128xf32>
    %c4_25 = arith.constant 4 : index
    %132 = memref.load %arg4[%c4_25] : memref<32xf32, #tpu.memory_space<smem>>
    %133 = vector.broadcast %132 : f32 to vector<8x128xf32>
    %134 = arith.mulf %15, %133 : vector<8x128xf32>
    %c12 = arith.constant 12 : index
    %135 = memref.load %arg4[%c12] : memref<32xf32, #tpu.memory_space<smem>>
    %136 = vector.broadcast %135 : f32 to vector<8x128xf32>
    %137 = arith.mulf %27, %136 : vector<8x128xf32>
    %138 = arith.addf %134, %137 : vector<8x128xf32>
    %c20 = arith.constant 20 : index
    %139 = memref.load %arg4[%c20] : memref<32xf32, #tpu.memory_space<smem>>
    %140 = vector.broadcast %139 : f32 to vector<8x128xf32>
    %141 = arith.mulf %39, %140 : vector<8x128xf32>
    %142 = arith.addf %138, %141 : vector<8x128xf32>
    %c28 = arith.constant 28 : index
    %143 = memref.load %arg4[%c28] : memref<32xf32, #tpu.memory_space<smem>>
    %144 = vector.broadcast %143 : f32 to vector<8x128xf32>
    %145 = arith.mulf %51, %144 : vector<8x128xf32>
    %146 = arith.addf %142, %145 : vector<8x128xf32>
    %c4_26 = arith.constant 4 : index
    %147 = memref.load %arg5[%c4_26] : memref<8xf32, #tpu.memory_space<smem>>
    %148 = vector.broadcast %147 : f32 to vector<8x128xf32>
    %149 = arith.addf %146, %148 : vector<8x128xf32>
    %cst_27 = arith.constant 0.000000e+00 : f32
    %150 = vector.broadcast %cst_27 : f32 to vector<8x128xf32>
    %151 = arith.maximumf %149, %150 : vector<8x128xf32>
    %c5_28 = arith.constant 5 : index
    %152 = memref.load %arg4[%c5_28] : memref<32xf32, #tpu.memory_space<smem>>
    %153 = vector.broadcast %152 : f32 to vector<8x128xf32>
    %154 = arith.mulf %15, %153 : vector<8x128xf32>
    %c13 = arith.constant 13 : index
    %155 = memref.load %arg4[%c13] : memref<32xf32, #tpu.memory_space<smem>>
    %156 = vector.broadcast %155 : f32 to vector<8x128xf32>
    %157 = arith.mulf %27, %156 : vector<8x128xf32>
    %158 = arith.addf %154, %157 : vector<8x128xf32>
    %c21 = arith.constant 21 : index
    %159 = memref.load %arg4[%c21] : memref<32xf32, #tpu.memory_space<smem>>
    %160 = vector.broadcast %159 : f32 to vector<8x128xf32>
    %161 = arith.mulf %39, %160 : vector<8x128xf32>
    %162 = arith.addf %158, %161 : vector<8x128xf32>
    %c29 = arith.constant 29 : index
    %163 = memref.load %arg4[%c29] : memref<32xf32, #tpu.memory_space<smem>>
    %164 = vector.broadcast %163 : f32 to vector<8x128xf32>
    %165 = arith.mulf %51, %164 : vector<8x128xf32>
    %166 = arith.addf %162, %165 : vector<8x128xf32>
    %c5_29 = arith.constant 5 : index
    %167 = memref.load %arg5[%c5_29] : memref<8xf32, #tpu.memory_space<smem>>
    %168 = vector.broadcast %167 : f32 to vector<8x128xf32>
    %169 = arith.addf %166, %168 : vector<8x128xf32>
    %cst_30 = arith.constant 0.000000e+00 : f32
    %170 = vector.broadcast %cst_30 : f32 to vector<8x128xf32>
    %171 = arith.maximumf %169, %170 : vector<8x128xf32>
    %c6_31 = arith.constant 6 : index
    %172 = memref.load %arg4[%c6_31] : memref<32xf32, #tpu.memory_space<smem>>
    %173 = vector.broadcast %172 : f32 to vector<8x128xf32>
    %174 = arith.mulf %15, %173 : vector<8x128xf32>
    %c14 = arith.constant 14 : index
    %175 = memref.load %arg4[%c14] : memref<32xf32, #tpu.memory_space<smem>>
    %176 = vector.broadcast %175 : f32 to vector<8x128xf32>
    %177 = arith.mulf %27, %176 : vector<8x128xf32>
    %178 = arith.addf %174, %177 : vector<8x128xf32>
    %c22 = arith.constant 22 : index
    %179 = memref.load %arg4[%c22] : memref<32xf32, #tpu.memory_space<smem>>
    %180 = vector.broadcast %179 : f32 to vector<8x128xf32>
    %181 = arith.mulf %39, %180 : vector<8x128xf32>
    %182 = arith.addf %178, %181 : vector<8x128xf32>
    %c30 = arith.constant 30 : index
    %183 = memref.load %arg4[%c30] : memref<32xf32, #tpu.memory_space<smem>>
    %184 = vector.broadcast %183 : f32 to vector<8x128xf32>
    %185 = arith.mulf %51, %184 : vector<8x128xf32>
    %186 = arith.addf %182, %185 : vector<8x128xf32>
    %c6_32 = arith.constant 6 : index
    %187 = memref.load %arg5[%c6_32] : memref<8xf32, #tpu.memory_space<smem>>
    %188 = vector.broadcast %187 : f32 to vector<8x128xf32>
    %189 = arith.addf %186, %188 : vector<8x128xf32>
    %cst_33 = arith.constant 0.000000e+00 : f32
    %190 = vector.broadcast %cst_33 : f32 to vector<8x128xf32>
    %191 = arith.maximumf %189, %190 : vector<8x128xf32>
    %c7_34 = arith.constant 7 : index
    %192 = memref.load %arg4[%c7_34] : memref<32xf32, #tpu.memory_space<smem>>
    %193 = vector.broadcast %192 : f32 to vector<8x128xf32>
    %194 = arith.mulf %15, %193 : vector<8x128xf32>
    %c15 = arith.constant 15 : index
    %195 = memref.load %arg4[%c15] : memref<32xf32, #tpu.memory_space<smem>>
    %196 = vector.broadcast %195 : f32 to vector<8x128xf32>
    %197 = arith.mulf %27, %196 : vector<8x128xf32>
    %198 = arith.addf %194, %197 : vector<8x128xf32>
    %c23 = arith.constant 23 : index
    %199 = memref.load %arg4[%c23] : memref<32xf32, #tpu.memory_space<smem>>
    %200 = vector.broadcast %199 : f32 to vector<8x128xf32>
    %201 = arith.mulf %39, %200 : vector<8x128xf32>
    %202 = arith.addf %198, %201 : vector<8x128xf32>
    %c31 = arith.constant 31 : index
    %203 = memref.load %arg4[%c31] : memref<32xf32, #tpu.memory_space<smem>>
    %204 = vector.broadcast %203 : f32 to vector<8x128xf32>
    %205 = arith.mulf %51, %204 : vector<8x128xf32>
    %206 = arith.addf %202, %205 : vector<8x128xf32>
    %c7_35 = arith.constant 7 : index
    %207 = memref.load %arg5[%c7_35] : memref<8xf32, #tpu.memory_space<smem>>
    %208 = vector.broadcast %207 : f32 to vector<8x128xf32>
    %209 = arith.addf %206, %208 : vector<8x128xf32>
    %cst_36 = arith.constant 0.000000e+00 : f32
    %210 = vector.broadcast %cst_36 : f32 to vector<8x128xf32>
    %211 = arith.maximumf %209, %210 : vector<8x128xf32>
    %c0_37 = arith.constant 0 : index
    %212 = memref.load %arg6[%c0_37] : memref<8xf32, #tpu.memory_space<smem>>
    %213 = vector.broadcast %212 : f32 to vector<8x128xf32>
    %214 = arith.mulf %71, %213 : vector<8x128xf32>
    %c1_38 = arith.constant 1 : index
    %215 = memref.load %arg6[%c1_38] : memref<8xf32, #tpu.memory_space<smem>>
    %216 = vector.broadcast %215 : f32 to vector<8x128xf32>
    %217 = arith.mulf %91, %216 : vector<8x128xf32>
    %218 = arith.addf %214, %217 : vector<8x128xf32>
    %c2_39 = arith.constant 2 : index
    %219 = memref.load %arg6[%c2_39] : memref<8xf32, #tpu.memory_space<smem>>
    %220 = vector.broadcast %219 : f32 to vector<8x128xf32>
    %221 = arith.mulf %111, %220 : vector<8x128xf32>
    %222 = arith.addf %218, %221 : vector<8x128xf32>
    %c3_40 = arith.constant 3 : index
    %223 = memref.load %arg6[%c3_40] : memref<8xf32, #tpu.memory_space<smem>>
    %224 = vector.broadcast %223 : f32 to vector<8x128xf32>
    %225 = arith.mulf %131, %224 : vector<8x128xf32>
    %226 = arith.addf %222, %225 : vector<8x128xf32>
    %c4_41 = arith.constant 4 : index
    %227 = memref.load %arg6[%c4_41] : memref<8xf32, #tpu.memory_space<smem>>
    %228 = vector.broadcast %227 : f32 to vector<8x128xf32>
    %229 = arith.mulf %151, %228 : vector<8x128xf32>
    %230 = arith.addf %226, %229 : vector<8x128xf32>
    %c5_42 = arith.constant 5 : index
    %231 = memref.load %arg6[%c5_42] : memref<8xf32, #tpu.memory_space<smem>>
    %232 = vector.broadcast %231 : f32 to vector<8x128xf32>
    %233 = arith.mulf %171, %232 : vector<8x128xf32>
    %234 = arith.addf %230, %233 : vector<8x128xf32>
    %c6_43 = arith.constant 6 : index
    %235 = memref.load %arg6[%c6_43] : memref<8xf32, #tpu.memory_space<smem>>
    %236 = vector.broadcast %235 : f32 to vector<8x128xf32>
    %237 = arith.mulf %191, %236 : vector<8x128xf32>
    %238 = arith.addf %234, %237 : vector<8x128xf32>
    %c7_44 = arith.constant 7 : index
    %239 = memref.load %arg6[%c7_44] : memref<8xf32, #tpu.memory_space<smem>>
    %240 = vector.broadcast %239 : f32 to vector<8x128xf32>
    %241 = arith.mulf %211, %240 : vector<8x128xf32>
    %242 = arith.addf %238, %241 : vector<8x128xf32>
    %c0_45 = arith.constant 0 : index
    %243 = memref.load %arg7[%c0_45] : memref<1xf32, #tpu.memory_space<smem>>
    %244 = vector.broadcast %243 : f32 to vector<8x128xf32>
    %245 = arith.addf %242, %244 : vector<8x128xf32>
    %246 = arith.negf %245 : vector<8x128xf32>
    %247 = math.exp %246 : vector<8x128xf32>
    %cst_46 = arith.constant 1.000000e+00 : f32
    %248 = vector.broadcast %cst_46 : f32 to vector<8x128xf32>
    %249 = arith.addf %248, %247 : vector<8x128xf32>
    %250 = arith.divf %248, %249 : vector<8x128xf32>
    %c0_47 = arith.constant 0 : index
    %c0_48 = arith.constant 0 : index
    %251 = vector.load %arg8[%c0_47, %c0_48] : memref<8x128xf32, #tpu.memory_space<vmem>>, vector<8x128xf32>
    tpu.vector_store %arg8[%c0_47, %c0_48], %250 {strides = array<i32>} : memref<8x128xf32, #tpu.memory_space<vmem>>, vector<8x128xf32>,
    return
  }
  func.func @transform_0(%arg0: i32) -> (i32, i32, i32) {
    %c0_i32 = arith.constant 0 : i32
    %c0_i32_0 = arith.constant 0 : i32
    %c0_i32_1 = arith.constant 0 : i32
    return %c0_i32, %arg0, %c0_i32_0 : i32, i32, i32
  }
  func.func @transform_1(%arg0: i32) -> i32 {
    %c0_i32 = arith.constant 0 : i32
    %c0_i32_0 = arith.constant 0 : i32
    return %c0_i32 : i32
  }
  func.func @transform_2(%arg0: i32) -> i32 {
    %c0_i32 = arith.constant 0 : i32
    %c0_i32_0 = arith.constant 0 : i32
    return %c0_i32 : i32
  }
  func.func @transform_3(%arg0: i32) -> i32 {
    %c0_i32 = arith.constant 0 : i32
    %c0_i32_0 = arith.constant 0 : i32
    return %c0_i32 : i32
  }
  func.func @transform_4(%arg0: i32) -> i32 {
    %c0_i32 = arith.constant 0 : i32
    %c0_i32_0 = arith.constant 0 : i32
    return %c0_i32 : i32
  }
  func.func @transform_5(%arg0: i32) -> i32 {
    %c0_i32 = arith.constant 0 : i32
    %c0_i32_0 = arith.constant 0 : i32
    return %c0_i32 : i32
  }
  func.func @transform_6(%arg0: i32) -> i32 {
    %c0_i32 = arith.constant 0 : i32
    %c0_i32_0 = arith.constant 0 : i32
    return %c0_i32 : i32
  }
  func.func @transform_7(%arg0: i32) -> (i32, i32) {
    %c0_i32 = arith.constant 0 : i32
    %c0_i32_0 = arith.constant 0 : i32
    return %arg0, %c0_i32 : i32, i32
  }
}

</mosaic_0001>

<bundles_post_ra>
// kernel: xormodel_forward.1
= control target key start
LH: loop header
LB: loop body
LE: loop exit
PB: predicated region body
PF: predicated region fallthrough
CT: control target
= control target key end

     0   :  { %13 = vsyncpa [#allocation4], 0  ;;  %s747_s0 = inlined_call_operand.vmem [shape: f32[2,8,128], index: 0, kind: input, shape index: {}]   ;;  %s748_s1 = inlined_call_operand.vmem [shape: f32[8], index: 1, kind: input, shape index: {}]   ;;  %s749_s2 = inlined_call_operand.vmem [shape: f32[4], index: 2, kind: input, shape index: {}]   ;;  %s750_s3 = inlined_call_operand.vmem [shape: f32[32], index: 3, kind: input, shape index: {}]   ;;  %s751_s4 = inlined_call_operand.vmem [shape: f32[8], index: 4, kind: input, shape index: {}]   ;;  %s752_s5 = inlined_call_operand.vmem [shape: f32[8], index: 5, kind: input, shape index: {}]   ;;  %s753_s6 = inlined_call_operand.<no memory space> [shape: f32[1], index: 6, kind: input, shape index: {}]   ;;  %s754_s7 = inlined_call_operand.vmem [shape: f32[8,128], index: 7, kind: output, shape index: {}]  }
   0x1   :  { %14 = vsyncpa [#allocation6], 0  ;;  %s34_s26 = sshll.u32 %s749_s2, 4  ;;  %s35_s26 = int_to_ptr.vmem [resolvable:$true] %s34_s26 }
   0x2   :  { %15 = vsyncpa [#allocation9], 0  ;;  %s54_s29 = sshll.u32 %s751_s4, 4  ;;  %s399_s30 = scalar_lea.vmem %s35_s26, 16  ;;  %s55_s29 = int_to_ptr.vmem [resolvable:$true] %s54_s29 }
   0x3   :  { %p400_p0 = scmp.ne.s32.totalorder %s35_s26, %s399_s30  ;;  %p404_p1 = scmp.lt.s32.totalorder %s35_s26, %s35_s26 }
   0x4   :  { %p405_p2 = scmp.lt.s32.totalorder %s399_s30, %s399_s30 }
   0x6   :  { %p406_p3 = por %p405_p2, %p404_p1 }
   0x8   :  { %p407_p4 = pnand %p406_p3, %p400_p0 }
   0xa   :  { %410 = shalt.err (!%p407_p4)
}
   0xb   :  { %s465_s8 = smov [#allocation5]   ;;  %s411_s9 = scalar_lea.vmem %s55_s29, 16 }
   0xc   :  { %37 = dma.vmem_to_smem %s35_s26, 16, %s465_s8, [#allocation6]  }
   0xd   :  { %p412_p5 = scmp.ne.s32.totalorder %s55_s29, %s411_s9  ;;  %p416_p6 = scmp.lt.s32.totalorder %s55_s29, %s55_s29 }
   0xe   :  { %p417_p7 = scmp.lt.s32.totalorder %s411_s9, %s411_s9 }
  0x10   :  { %p418_p8 = por %p417_p7, %p416_p6 }
  0x12   :  { %p419_p9 = pnand %p418_p8, %p412_p5 }
  0x14   :  { %422 = shalt.err (!%p419_p9)
}
  0x15   :  { %s466_s2 = smov [#allocation8]   ;;  %s24_s11 = sshll.u32 %s748_s1, 4  ;;  %s25_s11 = int_to_ptr.vmem [resolvable:$true] %s24_s11 }
  0x16   :  { %57 = dma.vmem_to_smem %s55_s29, 16, %s466_s2, [#allocation9]  }
  0x17   :  { %s44_s14 = sshll.u32 %s750_s3, 4  ;;  %s423_s15 = scalar_lea.vmem %s25_s11, 16  ;;  %s45_s14 = int_to_ptr.vmem [resolvable:$true] %s44_s14 }
  0x18   :  { %p424_p10 = scmp.ne.s32.totalorder %s25_s11, %s423_s15  ;;  %p428_p11 = scmp.lt.s32.totalorder %s25_s11, %s25_s11 }
  0x19   :  { %p429_p12 = scmp.lt.s32.totalorder %s423_s15, %s423_s15 }
  0x1b   :  { %p430_p13 = por %p429_p12, %p428_p11 }
  0x1d   :  { %p431_p0 = pnand %p430_p13, %p424_p10 }
  0x1f   :  { %434 = shalt.err (!%p431_p0)
}
  0x20   :  { %s467_s16 = smov [#allocation3]   ;;  %s435_s17 = scalar_lea.vmem %s45_s14, 16 }
  0x21   :  { %27 = dma.vmem_to_smem %s25_s11, 16, %s467_s16, [#allocation4]  }
  0x22   :  { %p436_p1 = scmp.ne.s32.totalorder %s45_s14, %s435_s17  ;;  %p440_p2 = scmp.lt.s32.totalorder %s45_s14, %s45_s14 }
  0x23   :  { %p441_p3 = scmp.lt.s32.totalorder %s435_s17, %s435_s17 }
  0x25   :  { %p442_p4 = por %p441_p3, %p440_p2 }
  0x27   :  { %p443_p5 = pnand %p442_p4, %p436_p1 }
  0x29   :  { %446 = shalt.err (!%p443_p5)
}
  0x2a   :  { %s468_s1 = smov [#allocation7]   ;;  %s64_s19 = sshll.u32 %s752_s5, 4  ;;  %s65_s19 = int_to_ptr.vmem [resolvable:$true] %s64_s19 }
  0x2b   :  { %47 = dma.vmem_to_smem %s45_s14, 16, %s468_s1, [#allocation6]  }
  0x2c   :  { %s447_s20 = scalar_lea.vmem %s65_s19, 16  ;;  %p452_p7 = scmp.lt.s32.totalorder %s65_s19, %s65_s19 }
  0x2d   :  { %p448_p6 = scmp.ne.s32.totalorder %s65_s19, %s447_s20  ;;  %p453_p8 = scmp.lt.s32.totalorder %s447_s20, %s447_s20 }
  0x2f   :  { %p454_p9 = por %p453_p8, %p452_p7 }
  0x31   :  { %p455_p10 = pnand %p454_p9, %p448_p6 }
  0x33   :  { %458 = shalt.err (!%p455_p10)
}
  0x34   :  { %s469_s21 = smov [#allocation10]  }
  0x35   :  { %67 = dma.vmem_to_smem %s65_s19, 16, %s469_s21, [#allocation9]  }
  0x36   :  { %459 = dma.done.wait [#allocation4], 16  }
  0x37   :  { %460 = vsyncadd [#allocation4], 4294967280 }
  0x38   :  { %461 = dma.done.wait [#allocation6], 32  }
  0x39   :  { %462 = vsyncadd [#allocation6], 4294967264 }
  0x3a   :  { %463 = dma.done.wait [#allocation9], 32  }
  0x3b   :  { %464 = vsyncadd [#allocation9], 4294967264 }
  0x3c   :  { %85 = sfence }
  0x3d   :  { %s89_s22 = sld [smem:[#allocation3]]  ;;  %s334_s23 = sld [smem:[#allocation3 + $0x4]]  ;;  %v86_v0 = vld [vmem:[%s747_s0] sm:$0xff]  ;;  %v333_v1 = vld [vmem:[%s747_s0 + $0x8] sm:$0xff] }
  0x3e   :  { %s525_s5 = sld [smem:[#allocation5]]  ;;  %s335_s24 = sld [smem:[#allocation3 + $0x1]] }
  0x3f   :  { %s336_s25 = sld [smem:[#allocation3 + $0x5]]  ;;  %s527_s26 = sld [smem:[#allocation5 + $0x1]] }
  0x40   :  { %s338_s27 = sld [smem:[#allocation3 + $0x2]]  ;;  %s339_s28 = sld [smem:[#allocation3 + $0x6]] }
  0x41   :  { %s535_s2 = sld [smem:[#allocation5 + $0x2]]  ;;  %s537_s4 = sld [smem:[#allocation3 + $0x3]] }
  0x42   :  { %s539_s10 = sld [smem:[#allocation3 + $0x7]]  ;;  %s541_s11 = sld [smem:[#allocation5 + $0x3]] }
  0x43   :  { %v90_v2 = vstv %s89_s22  ;;  %v93_v3 = vstv %s334_s23  ;;  %s543_s12 = sld [smem:[#allocation7]]  ;;  %s555_s16 = sld [smem:[#allocation7 + $0x1]] }
  0x44   :  { %s545_s13 = sld [smem:[#allocation7 + $0x8]]  ;;  %v91_v4 = vmul.f32 %v90_v2, %v86_v0  ;;  %v94_v5 = vmul.f32 %v333_v1, %v93_v3  ;;  %v101_v6 = vstv %s335_s24  ;;  %v97_v7 = vstv %s525_s5  ;;  %s557_s17 = sld [smem:[#allocation7 + $0x9]] }
  0x45   :  { %s547_s14 = sld [smem:[#allocation7 + $0x10]]  ;;  %v102_v8 = vmul.f32 %v101_v6, %v86_v0  ;;  %v104_v9 = vstv %s336_s25  ;;  %v108_v10 = vstv %s527_s26  ;;  %s559_s1 = sld [smem:[#allocation7 + $0x11]] }
  0x46   :  { %s549_s0 = sld [smem:[#allocation7 + $0x18]]  ;;  %v95_v11 = vadd.f32 %v94_v5, %v91_v4  ;;  %v105_v12 = vmul.f32 %v333_v1, %v104_v9  ;;  %v112_v13 = vstv %s338_s27  ;;  %v115_v14 = vstv %s339_s28  ;;  %s563_s3 = sld [smem:[#allocation7 + $0x19]] }
  0x47   :  { %s553_s15 = sld [smem:[#allocation8]]  ;;  %v113_v15 = vmul.f32 %v112_v13, %v86_v0  ;;  %v116_v16 = vmul.f32 %v333_v1, %v115_v14  ;;  %v119_v17 = vstv %s535_s2  ;;  %v123_v18 = vstv %s537_s4  ;;  %s566_s18 = sld [smem:[#allocation7 + $0x2]] }
  0x48   :  { %v98_v19 = vadd.f32 %v97_v7, %v95_v11  ;;  %v106_v20 = vadd.f32 %v105_v12, %v102_v8  ;;  %v124_v21 = vmul.f32 %v123_v18, %v86_v0  ;;  %v126_v22 = vstv %s539_s10  ;;  %s568_s19 = sld [smem:[#allocation7 + $0xa]]  ;;  %s581_s22 = sld [smem:[#allocation8 + $0x1]] }
  0x49   :  { %v117_v23 = vadd.f32 %v116_v16, %v113_v15  ;;  %v127_v24 = vmul.f32 %v333_v1, %v126_v22  ;;  %v134_v25 = vstv %s543_s12  ;;  %s571_s20 = sld [smem:[#allocation7 + $0x12]]  ;;  %v130_v28 = vstv %s541_s11  ;;  %s583_s23 = sld [smem:[#allocation7 + $0x3]] }
  0x4a   :  { %v573_v26 = vmax.f32 %v98_v19, 0.0  ;;  %v109_v27 = vadd.f32 %v108_v10, %v106_v20  ;;  %v137_v29 = vstv %s545_s13  ;;  %s577_s21 = sld [smem:[#allocation7 + $0x1a]]  ;;  %v153_v36 = vstv %s555_s16  ;;  %s590_s5 = sld [smem:[#allocation7 + $0xb]] }
  0x4b   :  { %v120_v30 = vadd.f32 %v119_v17, %v117_v23  ;;  %v128_v31 = vadd.f32 %v127_v24, %v124_v21  ;;  %v141_v32 = vstv %s547_s14  ;;  %v156_v37 = vstv %s557_s17  ;;  %s596_s24 = sld [smem:[#allocation7 + $0x13]]  ;;  %s604_s26 = sld [smem:[#allocation8 + $0x2]] }
  0x4c   :  { %v145_v33 = vstv %s549_s0  ;;  %v585_v34 = vmax.f32 %v109_v27, 0.0  ;;  %v135_v35 = vmul.f32 %v134_v25, %v573_v26  ;;  %v154_v40 = vmul.f32 %v153_v36, %v573_v26  ;;  %s598_s25 = sld [smem:[#allocation7 + $0x1b]]  ;;  %s611_s27 = sld [smem:[#allocation7 + $0x4]] }
  0x4d   :  { %v592_v38 = vmax.f32 %v120_v30, 0.0  ;;  %v131_v39 = vadd.f32 %v130_v28, %v128_v31  ;;  %v160_v41 = vstv %s559_s1  ;;  %v149_v43 = vstv %s553_s15  ;;  %s615_s28 = sld [smem:[#allocation8 + $0x3]]  ;;  %s617_s29 = sld [smem:[#allocation7 + $0xc]] }
  0x4e   :  { %v138_v42 = vmul.f32 %v137_v29, %v585_v34  ;;  %v157_v44 = vmul.f32 %v156_v37, %v585_v34  ;;  %v164_v45 = vstv %s563_s3  ;;  %v172_v49 = vstv %s566_s18  ;;  %s623_s30 = sld [smem:[#allocation7 + $0x14]]  ;;  %s629_s9 = sld [smem:[#allocation7 + $0x5]] }
  0x4f   :  { %v606_v46 = vmax.f32 %v131_v39, 0.0  ;;  %v142_v47 = vmul.f32 %v141_v32, %v592_v38  ;;  %v161_v48 = vmul.f32 %v160_v41, %v592_v38  ;;  %v173_v52 = vmul.f32 %v172_v49, %v573_v26  ;;  %s627_s8 = sld [smem:[#allocation7 + $0x1c]]  ;;  %s634_s2 = sld [smem:[#allocation7 + $0xd]] }
  0x50   :  { %v139_v50 = vadd.f32 %v138_v42, %v135_v35  ;;  %v158_v51 = vadd.f32 %v157_v44, %v154_v40  ;;  %v175_v53 = vstv %s568_s19  ;;  %v179_v57 = vstv %s571_s20  ;;  %s638_s4 = sld [smem:[#allocation7 + $0x15]]  ;;  %s645_s11 = sld [smem:[#allocation8 + $0x4]] }
  0x51   :  { %v146_v54 = vmul.f32 %v145_v33, %v606_v46  ;;  %v165_v55 = vmul.f32 %v164_v45, %v606_v46  ;;  %v176_v56 = vmul.f32 %v175_v53, %v585_v34  ;;  %v180_v60 = vmul.f32 %v179_v57, %v592_v38  ;;  %s640_s10 = sld [smem:[#allocation7 + $0x1d]]  ;;  %s653_s12 = sld [smem:[#allocation7 + $0x6]] }
  0x52   :  { %v143_v58 = vadd.f32 %v142_v47, %v139_v50  ;;  %v162_v59 = vadd.f32 %v161_v48, %v158_v51  ;;  %v183_v61 = vstv %s577_s21  ;;  %v168_v62 = vstv %s581_s22  ;;  %s655_s13 = sld [smem:[#allocation7 + $0xe]]  ;;  %s659_s14 = sld [smem:[#allocation8 + $0x5]] }
  0x53   :  { %v177_v63 = vadd.f32 %v176_v56, %v173_v52  ;;  %v184_v0 = vmul.f32 %v183_v61, %v606_v46  ;;  %v191_v1 = vstv %s583_s23  ;;  %v194_v5 = vstv %s590_s5  ;;  %s664_s0 = sld [smem:[#allocation7 + $0x16]]  ;;  %s671_s16 = sld [smem:[#allocation7 + $0x7]] }
  0x54   :  { %v147_v2 = vadd.f32 %v146_v54, %v143_v58  ;;  %v166_v3 = vadd.f32 %v165_v55, %v162_v59  ;;  %v192_v4 = vmul.f32 %v191_v1, %v573_v26  ;;  %v195_v7 = vmul.f32 %v194_v5, %v585_v34  ;;  %s666_s15 = sld [smem:[#allocation7 + $0x1e]]  ;;  %s678_s17 = sld [smem:[#allocation7 + $0xf]] }
  0x55   :  { %v181_v6 = vadd.f32 %v180_v60, %v177_v63  ;;  %v198_v8 = vstv %s596_s24  ;;  %v202_v9 = vstv %s598_s25  ;;  %v187_v12 = vstv %s604_s26  ;;  %s680_s1 = sld [smem:[#allocation7 + $0x17]]  ;;  %s688_s3 = sld [smem:[#allocation8 + $0x6]] }
  0x56   :  { %v647_v10 = vadd.f32 %v149_v43, %v147_v2  ;;  %v649_v11 = vadd.f32 %v168_v62, %v166_v3  ;;  %v199_v13 = vmul.f32 %v198_v8, %v592_v38  ;;  %v196_v15 = vadd.f32 %v195_v7, %v192_v4  ;;  %s690_s18 = sld [smem:[#allocation7 + $0x1f]]  ;;  %s694_s19 = sld [smem:[#allocation10]] }
  0x57   :  { %v185_v14 = vadd.f32 %v184_v0, %v181_v6  ;;  %v203_v16 = vmul.f32 %v202_v9, %v606_v46  ;;  %v210_v17 = vstv %s611_s27  ;;  %v206_v18 = vstv %s615_s28  ;;  %s700_s20 = sld [smem:[#allocation10 + $0x1]]  ;;  %s702_s21 = sld [smem:[#allocation10 + $0x2]] }
  0x58   :  { %v211_v19 = vmul.f32 %v210_v17, %v573_v26  ;;  %v213_v20 = vstv %s617_s29  ;;  %v151_v21 = vmax.f32 %v647_v10, 0.0  ;;  %v200_v22 = vadd.f32 %v199_v13, %v196_v15  ;;  %s706_s22 = sld [smem:[#allocation8 + $0x7]]  ;;  %s712_s23 = sld [smem:[#allocation10 + $0x3]] }
  0x59   :  { %v214_v23 = vmul.f32 %v213_v20, %v585_v34  ;;  %v217_v24 = vstv %s623_s30  ;;  %v673_v25 = vadd.f32 %v187_v12, %v185_v14  ;;  %v221_v28 = vstv %s627_s8  ;;  %s714_s5 = sld [smem:[#allocation10 + $0x4]]  ;;  %s721_s24 = sld [smem:[#allocation10 + $0x5]] }
  0x5a   :  { %v218_v27 = vmul.f32 %v217_v24, %v592_v38  ;;  %v229_v29 = vstv %s629_s9  ;;  %v170_v30 = vmax.f32 %v649_v11, 0.0  ;;  %v204_v31 = vadd.f32 %v203_v16, %v200_v22  ;;  %s728_s25 = sld [smem:[#allocation10 + $0x6]]  ;;  %s388_s26 = sld [smem:[#allocation10 + $0x7]] }
  0x5b   :  { %v215_v32 = vadd.f32 %v214_v23, %v211_v19  ;;  %v222_v33 = vmul.f32 %v221_v28, %v606_v46  ;;  %v230_v35 = vmul.f32 %v229_v29, %v573_v26  ;;  %v232_v36 = vstv %s634_s2 }
  0x5c   :  { %v236_v37 = vstv %s638_s4  ;;  %v240_v39 = vstv %s640_s10  ;;  %v207_v40 = vadd.f32 %v206_v18, %v204_v31  ;;  %v233_v42 = vmul.f32 %v232_v36, %v585_v34 }
  0x5d   :  { %v219_v41 = vadd.f32 %v218_v27, %v215_v32  ;;  %v237_v43 = vmul.f32 %v236_v37, %v592_v38  ;;  %v189_v44 = vmax.f32 %v673_v25, 0.0  ;;  %v225_v45 = vstv %s645_s11 }
  0x5e   :  { %v248_v47 = vstv %s653_s12  ;;  %v251_v48 = vstv %s655_s13  ;;  %v234_v50 = vadd.f32 %v233_v42, %v230_v35  ;;  %v241_v51 = vmul.f32 %v240_v39, %v606_v46 }
  0x5f   :  { %v223_v49 = vadd.f32 %v222_v33, %v219_v41  ;;  %v249_v52 = vmul.f32 %v248_v47, %v573_v26  ;;  %v244_v53 = vstv %s659_s14  ;;  %v252_v54 = vmul.f32 %v251_v48, %v585_v34 }
  0x60   :  { %v255_v55 = vstv %s664_s0  ;;  %v259_v56 = vstv %s666_s15  ;;  %v208_v57 = vmax.f32 %v207_v40, 0.0  ;;  %v238_v58 = vadd.f32 %v237_v43, %v234_v50 }
  0x61   :  { %v256_v59 = vmul.f32 %v255_v55, %v592_v38  ;;  %v260_v60 = vmul.f32 %v259_v56, %v606_v46  ;;  %v253_v61 = vadd.f32 %v252_v54, %v249_v52  ;;  %v267_v62 = vstv %s671_s16 }
  0x62   :  { %v270_v63 = vstv %s678_s17  ;;  %v274_v0 = vstv %s680_s1  ;;  %v226_v1 = vadd.f32 %v225_v45, %v223_v49  ;;  %v242_v2 = vadd.f32 %v241_v51, %v238_v58 }
  0x63   :  { %v268_v3 = vmul.f32 %v267_v62, %v573_v26  ;;  %v271_v4 = vmul.f32 %v270_v63, %v585_v34  ;;  %v257_v5 = vadd.f32 %v256_v59, %v253_v61  ;;  %v263_v6 = vstv %s688_s3 }
  0x64   :  { %v275_v7 = vmul.f32 %v274_v0, %v592_v38  ;;  %v278_v8 = vstv %s690_s18  ;;  %v245_v9 = vadd.f32 %v244_v53, %v242_v2  ;;  %v286_v13 = vstv %s694_s19 }
  0x65   :  { %v272_v11 = vadd.f32 %v271_v4, %v268_v3  ;;  %v279_v12 = vmul.f32 %v278_v8, %v606_v46  ;;  %v261_v14 = vadd.f32 %v260_v60, %v257_v5  ;;  %v287_v26 = vmul.f32 %v286_v13, %v151_v21 }
  0x66   :  { %v289_v34 = vstv %s700_s20  ;;  %v293_v15 = vstv %s702_s21  ;;  %v227_v38 = vmax.f32 %v226_v1, 0.0  ;;  %v282_v20 = vstv %s706_s22 }
  0x67   :  { %v276_v16 = vadd.f32 %v275_v7, %v272_v11  ;;  %v290_v17 = vmul.f32 %v289_v34, %v170_v30  ;;  %v294_v18 = vmul.f32 %v293_v15, %v189_v44  ;;  %v264_v19 = vadd.f32 %v263_v6, %v261_v14 }
  0x68   :  { %v297_v22 = vstv %s712_s23  ;;  %v301_v23 = vstv %s714_s5  ;;  %v246_v24 = vmax.f32 %v245_v9, 0.0  ;;  %v305_v28 = vstv %s721_s24 }
  0x69   :  { %v280_v46 = vadd.f32 %v279_v12, %v276_v16  ;;  %v291_v25 = vadd.f32 %v290_v17, %v287_v26  ;;  %v298_v27 = vmul.f32 %v297_v22, %v208_v57  ;;  %v265_v10 = vmax.f32 %v264_v19, 0.0 }
  0x6a   :  { %v302_v31 = vmul.f32 %v301_v23, %v227_v38  ;;  %v309_v32 = vstv %s728_s25  ;;  %v306_v36 = vmul.f32 %v305_v28, %v246_v24  ;;  %v313_v37 = vstv %s388_s26 }
  0x6b   :  { %v283_v21 = vadd.f32 %v282_v20, %v280_v46  ;;  %v295_v29 = vadd.f32 %v294_v18, %v291_v25  ;;  %v310_v39 = vmul.f32 %v309_v32, %v265_v10  ;;  %v317_v43 = vstv %s753_s6 }
  0x6d   :  { %v284_v33 = vmax.f32 %v283_v21, 0.0  ;;  %v299_v35 = vadd.f32 %v298_v27, %v295_v29 }
  0x6f   :  { %v303_v30 = vadd.f32 %v302_v31, %v299_v35  ;;  %v314_v41 = vmul.f32 %v313_v37, %v284_v33 }
  0x71   :  { %v307_v40 = vadd.f32 %v306_v36, %v303_v30 }
  0x73   :  { %v311_v42 = vadd.f32 %v310_v39, %v307_v40 }
  0x75   :  { %v315_v44 = vadd.f32 %v314_v41, %v311_v42 }
  0x77   :  { %v318_v45 = vadd.f32 %v317_v43, %v315_v44 }
  0x79   :  { %v389_v47 = vmul.f32 -1.442695, %v318_v45 }
  0x7b   :  { %395 = vpow2.f32 %v389_v47 }
  0x85   :  { %v396_v48 = vpop.eup %395 }
  0x86   :  { %v322_v49 = vadd.f32 1.0, %v396_v48 }
  0x88   :  { %397 = vrcp.f32 %v322_v49 }
  0x92   :  { %v398_v50 = vpop.eup %397 }
  0x93   :  { %325 = vst [vmem:[%s754_s7] sm:$0xff] %v398_v50 }
  0x94   :  { %330 = vsyncpa [#allocation4], 1 }
  0x95   :  { %331 = vsyncpa [#allocation6], 1 }
  0x96   :  { %332 = vsyncpa [#allocation9], 1 }

</bundles_post_ra>
